<compile_context>
chip_gen: v6e
topology: v6e:2x2x1
jax: 0.10.0
libtpu: 0.0.40
codegen_flags: <defaults>
</compile_context>

<pallas_src>
import math

import jax
import jax.numpy as jnp
from jax.experimental import pallas as pl
from jax.experimental.pallas import tpu as pltpu


def _round_up(x: int, m: int) -> int:
    return ((x + m - 1) // m) * m


def _diffeq_concat_kernel(
    x_ref,       # VMEM (d, TL)    x^T tile
    diff_ref,    # VMEM (1, TL)    diff^T tile
    w1t_ref,     # VMEM (H1, 1)    t * W1[0, :]  (already scaled by t)
    w1x_ref,     # VMEM (H1, d)    W1[1:, :]^T
    b1_ref,      # VMEM (H1, 1)
    w2_ref,      # VMEM (H2, H1)   W2^T
    b2_ref,      # VMEM (H2, 1)
    w3_ref,      # VMEM (d, H2)    W3^T
    b3_ref,      # VMEM (d, 1)
    dx_ref,      # VMEM (d, TL)    output dx^T tile
):
    x = x_ref[...]          # (d, TL)
    diff = diff_ref[...]    # (1, TL)

    # Layer 1: concat folded into (MXU matmul) + (rank-1 broadcast mul)
    h = (
        jnp.dot(w1x_ref[...], x, preferred_element_type=jnp.float32)
        + w1t_ref[...] * diff          # (H1,1)*(1,TL) broadcast
        + b1_ref[...]
    )
    h = jnp.tanh(h)

    # Layer 2
    h = jnp.dot(w2_ref[...], h, preferred_element_type=jnp.float32) + b2_ref[...]
    h = jnp.tanh(h)

    # Layer 3 (final activation = Identity), then scale by diff
    h = jnp.dot(w3_ref[...], h, preferred_element_type=jnp.float32) + b3_ref[...]
    dx_ref[...] = (h * diff).astype(dx_ref.dtype)


def diffeq_concat_forward(t, x, diff, params, *, target_tl=4096):
    """t: scalar, x: (..., n, d), diff: (..., n, 1) -> (dx, zeros_like(diff))."""
    w1, b1, w2, b2, w3, b3 = params
    d = x.shape[-1]
    lead = x.shape[:-1]
    M = math.prod(lead)
    H1 = w1.shape[1]
    H2 = w2.shape[1]

    t_f = jnp.asarray(t, dtype=jnp.float32)

    # --- layout plumbing (tiny XLA ops outside the kernel) ------------------
    x_t = x.reshape(M, d).astype(jnp.float32).T          # (d, M)  lane-dense
    diff_t = diff.reshape(M, 1).astype(jnp.float32).T    # (1, M)

    w1t_scaled = (t_f * w1[0:1, :].astype(jnp.float32)).T  # (H1, 1)
    w1x_t = w1[1:, :].astype(jnp.float32).T                # (H1, d)
    b1_t = b1.astype(jnp.float32).reshape(H1, 1)
    w2_t = w2.astype(jnp.float32).T                        # (H2, H1)
    b2_t = b2.astype(jnp.float32).reshape(H2, 1)
    w3_t = w3.astype(jnp.float32).T                        # (d, H2)
    b3_t = b3.astype(jnp.float32).reshape(d, 1)

    # --- lane tiling: TL multiple of 128, pad M up to a multiple of TL ------
    m128 = _round_up(max(M, 1), 128)
    TL = min(target_tl, m128)
    Mp = _round_up(M, TL)
    if Mp > M:
        x_t = jnp.pad(x_t, ((0, 0), (0, Mp - M)))
        diff_t = jnp.pad(diff_t, ((0, 0), (0, Mp - M)))

    grid = (Mp // TL,)
    const = lambda i: (0, 0)   # weights/biases: resident block, no re-fetch

    dx_t = pl.pallas_call(
        _diffeq_concat_kernel,
        out_shape=jax.ShapeDtypeStruct((d, Mp), jnp.float32),
        grid=grid,
        in_specs=[
            pl.BlockSpec((d, TL), lambda i: (0, i)),     # x^T
            pl.BlockSpec((1, TL), lambda i: (0, i)),     # diff^T
            pl.BlockSpec((H1, 1), const),                # t * W1 row 0
            pl.BlockSpec((H1, d), const),                # W1[1:]^T
            pl.BlockSpec((H1, 1), const),                # b1
            pl.BlockSpec((H2, H1), const),               # W2^T
            pl.BlockSpec((H2, 1), const),                # b2
            pl.BlockSpec((d, H2), const),                # W3^T
            pl.BlockSpec((d, 1), const),                 # b3
        ],
        out_specs=pl.BlockSpec((d, TL), lambda i: (0, i)),
        compiler_params=pltpu.CompilerParams(
            dimension_semantics=("parallel",),           # v7x: shard tiles on 2 TCs
        ),
    )(x_t, diff_t, w1t_scaled, w1x_t, b1_t, w2_t, b2_t, w3_t, b3_t)

    dx = dx_t[:, :M].T.reshape(*lead, d).astype(x.dtype)
    ddiff = jnp.zeros_like(diff)   # constant-zero output: no kernel/HBM stream
    return dx, ddiff


def init_params(key, dim, hidden_dims):
    """Deterministic synthetic init of the stribor MLP(dim+1, hidden_dims, dim)."""
    dims = [dim + 1] + list(hidden_dims) + [dim]
    keys = jax.random.split(key, 2 * (len(dims) - 1))
    ws, bs = [], []
    for i in range(len(dims) - 1):
        fan_in = dims[i]
        scale = 1.0 / jnp.sqrt(jnp.float32(fan_in))
        w = jax.random.uniform(keys[2 * i], (dims[i], dims[i + 1]),
                               dtype=jnp.float32, minval=-scale, maxval=scale)
        b = jax.random.uniform(keys[2 * i + 1], (dims[i + 1],),
                               dtype=jnp.float32, minval=-scale, maxval=scale)
        ws.append(w)
        bs.append(b)
    w1, w2, w3 = ws
    b1, b2, b3 = bs
    return (w1, b1, w2, b2, w3, b3)


def reference_forward(t, x, diff, params):
    """Pure-JAX reference matching the PyTorch module."""
    w1, b1, w2, b2, w3, b3 = params
    h = jnp.concatenate([t * diff, x], axis=-1)
    h = jnp.tanh(h @ w1 + b1)
    h = jnp.tanh(h @ w2 + b2)
    h = h @ w3 + b3              # final activation = Identity
    return h * diff, jnp.zeros_like(diff)


if __name__ == "__main__":
    B, N, d = 2, 8, 4
    hidden_dims = [32, 32]

    key = jax.random.PRNGKey(0)
    k_x, k_diff, k_p = jax.random.split(key, 3)

    x = jax.random.normal(k_x, (B, N, d), dtype=jnp.float32)
    diff = jax.random.uniform(k_diff, (B, N, 1), dtype=jnp.float32)
    t = jnp.float32(0.37)

    params = init_params(k_p, d, hidden_dims)

    dx, ddiff = diffeq_concat_forward(t, x, diff, params)
    jax.block_until_ready((dx, ddiff))

    dx_ref, ddiff_ref = reference_forward(t, x, diff, params)
    assert dx.shape == (B, N, d) and ddiff.shape == (B, N, 1)
    assert jnp.allclose(dx, dx_ref, atol=1e-5, rtol=1e-5)
    assert jnp.allclose(ddiff, ddiff_ref)

    print("KERNEL_OK")
</pallas_src>

<mosaic_0001>
module attributes {stable_mosaic.version = 11 : i64} {
  func.func @_diffeq_concat_kernel(%arg0: i32, %arg1: memref<4x128xf32, #tpu.memory_space<vmem>>, %arg2: memref<1x128xf32, #tpu.memory_space<vmem>>, %arg3: memref<32x1xf32, #tpu.memory_space<vmem>>, %arg4: memref<32x4xf32, #tpu.memory_space<vmem>>, %arg5: memref<32x1xf32, #tpu.memory_space<vmem>>, %arg6: memref<32x32xf32, #tpu.memory_space<vmem>>, %arg7: memref<32x1xf32, #tpu.memory_space<vmem>>, %arg8: memref<4x32xf32, #tpu.memory_space<vmem>>, %arg9: memref<4x1xf32, #tpu.memory_space<vmem>>, %arg10: memref<4x128xf32, #tpu.memory_space<vmem>>) attributes {dimension_semantics = [#tpu.dimension_semantics<parallel>], iteration_bounds = array<i64: 1>, scalar_prefetch = 0 : i64, scratch_operands = 0 : i64, tpu.core_type = #tpu.core_type<tc>, window_params = [{transform_indices = @transform_0, window_bounds = array<i64: 4, 128>}, {transform_indices = @transform_1, window_bounds = array<i64: 1, 128>}, {pipeline_mode = #tpu.pipeline_mode<synchronous>, transform_indices = @transform_2, window_bounds = array<i64: 32, 1>}, {pipeline_mode = #tpu.pipeline_mode<synchronous>, transform_indices = @transform_3, window_bounds = array<i64: 32, 4>}, {pipeline_mode = #tpu.pipeline_mode<synchronous>, transform_indices = @transform_4, window_bounds = array<i64: 32, 1>}, {pipeline_mode = #tpu.pipeline_mode<synchronous>, transform_indices = @transform_5, window_bounds = array<i64: 32, 32>}, {pipeline_mode = #tpu.pipeline_mode<synchronous>, transform_indices = @transform_6, window_bounds = array<i64: 32, 1>}, {pipeline_mode = #tpu.pipeline_mode<synchronous>, transform_indices = @transform_7, window_bounds = array<i64: 4, 32>}, {pipeline_mode = #tpu.pipeline_mode<synchronous>, transform_indices = @transform_8, window_bounds = array<i64: 4, 1>}, {transform_indices = @transform_9, window_bounds = array<i64: 4, 128>}]} {
    %c0 = arith.constant 0 : index
    %c0_0 = arith.constant 0 : index
    %0 = vector.load %arg1[%c0, %c0_0] : memref<4x128xf32, #tpu.memory_space<vmem>>, vector<4x128xf32>
    %c0_1 = arith.constant 0 : index
    %c0_2 = arith.constant 0 : index
    %1 = vector.load %arg2[%c0_1, %c0_2] : memref<1x128xf32, #tpu.memory_space<vmem>>, vector<1x128xf32>
    %c0_3 = arith.constant 0 : index
    %c0_4 = arith.constant 0 : index
    %2 = vector.load %arg4[%c0_3, %c0_4] : memref<32x4xf32, #tpu.memory_space<vmem>>, vector<32x4xf32>
    %cst = arith.constant dense<0.000000e+00> : vector<32x128xf32>
    %3 = tpu.matmul %2, %0, %cst {dimension_numbers = #tpu.dot_dimension_numbers<[1], [0], [0], [1], [0, 0, 1, 1], [], []>} : vector<32x4xf32>, vector<4x128xf32>, vector<32x128xf32> -> vector<32x128xf32>
    %c0_5 = arith.constant 0 : index
    %c0_6 = arith.constant 0 : index
    %4 = vector.load %arg3[%c0_5, %c0_6] : memref<32x1xf32, #tpu.memory_space<vmem>>, vector<32x1xf32>
    %5 = vector.broadcast %4 : vector<32x1xf32> to vector<32x128xf32>
    %6 = vector.broadcast %1 : vector<1x128xf32> to vector<32x128xf32>
    %7 = arith.mulf %5, %6 : vector<32x128xf32>
    %8 = arith.addf %3, %7 : vector<32x128xf32>
    %c0_7 = arith.constant 0 : index
    %c0_8 = arith.constant 0 : index
    %9 = vector.load %arg5[%c0_7, %c0_8] : memref<32x1xf32, #tpu.memory_space<vmem>>, vector<32x1xf32>
    %10 = vector.broadcast %9 : vector<32x1xf32> to vector<32x128xf32>
    %11 = arith.addf %8, %10 : vector<32x128xf32>
    %12 = math.tanh %11 : vector<32x128xf32>
    %c0_9 = arith.constant 0 : index
    %c0_10 = arith.constant 0 : index
    %13 = vector.load %arg6[%c0_9, %c0_10] : memref<32x32xf32, #tpu.memory_space<vmem>>, vector<32x32xf32>
    %cst_11 = arith.constant dense<0.000000e+00> : vector<32x128xf32>
    %14 = tpu.matmul %13, %12, %cst_11 {dimension_numbers = #tpu.dot_dimension_numbers<[1], [0], [0], [1], [0, 0, 1, 1], [], []>} : vector<32x32xf32>, vector<32x128xf32>, vector<32x128xf32> -> vector<32x128xf32>
    %c0_12 = arith.constant 0 : index
    %c0_13 = arith.constant 0 : index
    %15 = vector.load %arg7[%c0_12, %c0_13] : memref<32x1xf32, #tpu.memory_space<vmem>>, vector<32x1xf32>
    %16 = vector.broadcast %15 : vector<32x1xf32> to vector<32x128xf32>
    %17 = arith.addf %14, %16 : vector<32x128xf32>
    %18 = math.tanh %17 : vector<32x128xf32>
    %c0_14 = arith.constant 0 : index
    %c0_15 = arith.constant 0 : index
    %19 = vector.load %arg8[%c0_14, %c0_15] : memref<4x32xf32, #tpu.memory_space<vmem>>, vector<4x32xf32>
    %cst_16 = arith.constant dense<0.000000e+00> : vector<4x128xf32>
    %20 = tpu.matmul %19, %18, %cst_16 {dimension_numbers = #tpu.dot_dimension_numbers<[1], [0], [0], [1], [0, 0, 1, 1], [], []>} : vector<4x32xf32>, vector<32x128xf32>, vector<4x128xf32> -> vector<4x128xf32>
    %c0_17 = arith.constant 0 : index
    %c0_18 = arith.constant 0 : index
    %21 = vector.load %arg9[%c0_17, %c0_18] : memref<4x1xf32, #tpu.memory_space<vmem>>, vector<4x1xf32>
    %22 = vector.broadcast %21 : vector<4x1xf32> to vector<4x128xf32>
    %23 = arith.addf %20, %22 : vector<4x128xf32>
    %24 = vector.broadcast %1 : vector<1x128xf32> to vector<4x128xf32>
    %25 = arith.mulf %23, %24 : vector<4x128xf32>
    %c0_19 = arith.constant 0 : index
    %c0_20 = arith.constant 0 : index
    %26 = vector.load %arg10[%c0_19, %c0_20] : memref<4x128xf32, #tpu.memory_space<vmem>>, vector<4x128xf32>
    tpu.vector_store %arg10[%c0_19, %c0_20], %25 {strides = array<i32>} : memref<4x128xf32, #tpu.memory_space<vmem>>, vector<4x128xf32>,
    return
  }
  func.func @transform_0(%arg0: i32) -> (i32, i32) {
    %c0_i32 = arith.constant 0 : i32
    %c0_i32_0 = arith.constant 0 : i32
    return %c0_i32, %arg0 : i32, i32
  }
  func.func @transform_1(%arg0: i32) -> (i32, i32) {
    %c0_i32 = arith.constant 0 : i32
    %c0_i32_0 = arith.constant 0 : i32
    return %c0_i32, %arg0 : i32, i32
  }
  func.func @transform_2(%arg0: i32) -> (i32, i32) {
    %c0_i32 = arith.constant 0 : i32
    %c0_i32_0 = arith.constant 0 : i32
    %c0_i32_1 = arith.constant 0 : i32
    return %c0_i32, %c0_i32_0 : i32, i32
  }
  func.func @transform_3(%arg0: i32) -> (i32, i32) {
    %c0_i32 = arith.constant 0 : i32
    %c0_i32_0 = arith.constant 0 : i32
    %c0_i32_1 = arith.constant 0 : i32
    return %c0_i32, %c0_i32_0 : i32, i32
  }
  func.func @transform_4(%arg0: i32) -> (i32, i32) {
    %c0_i32 = arith.constant 0 : i32
    %c0_i32_0 = arith.constant 0 : i32
    %c0_i32_1 = arith.constant 0 : i32
    return %c0_i32, %c0_i32_0 : i32, i32
  }
  func.func @transform_5(%arg0: i32) -> (i32, i32) {
    %c0_i32 = arith.constant 0 : i32
    %c0_i32_0 = arith.constant 0 : i32
    %c0_i32_1 = arith.constant 0 : i32
    return %c0_i32, %c0_i32_0 : i32, i32
  }
  func.func @transform_6(%arg0: i32) -> (i32, i32) {
    %c0_i32 = arith.constant 0 : i32
    %c0_i32_0 = arith.constant 0 : i32
    %c0_i32_1 = arith.constant 0 : i32
    return %c0_i32, %c0_i32_0 : i32, i32
  }
  func.func @transform_7(%arg0: i32) -> (i32, i32) {
    %c0_i32 = arith.constant 0 : i32
    %c0_i32_0 = arith.constant 0 : i32
    %c0_i32_1 = arith.constant 0 : i32
    return %c0_i32, %c0_i32_0 : i32, i32
  }
  func.func @transform_8(%arg0: i32) -> (i32, i32) {
    %c0_i32 = arith.constant 0 : i32
    %c0_i32_0 = arith.constant 0 : i32
    %c0_i32_1 = arith.constant 0 : i32
    return %c0_i32, %c0_i32_0 : i32, i32
  }
  func.func @transform_9(%arg0: i32) -> (i32, i32) {
    %c0_i32 = arith.constant 0 : i32
    %c0_i32_0 = arith.constant 0 : i32
    return %c0_i32, %arg0 : i32, i32
  }
}

</mosaic_0001>

<bundles_post_ra>
// kernel: tpu_custom_call.1
= control target key start
LH: loop header
LB: loop body
LE: loop exit
PB: predicated region body
PF: predicated region fallthrough
CT: control target
= control target key end

     0   :  { %vm86_vm0 = vcmask 1043456   ;;  %vm73_vm1 = vcmask 31744   ;;  %v539_v5 = vmov 0   ;;  %s684_s0 = inlined_call_operand.vmem [shape: f32[4,128], index: 0, kind: input, shape index: {}]   ;;  %s685_s1 = inlined_call_operand.vmem [shape: f32[1,128], index: 1, kind: input, shape index: {}]   ;;  %s686_s2 = inlined_call_operand.vmem [shape: f32[32,1], index: 2, kind: input, shape index: {}]   ;;  %s687_s3 = inlined_call_operand.vmem [shape: f32[32,4], index: 3, kind: input, shape index: {}]   ;;  %s688_s4 = inlined_call_operand.vmem [shape: f32[32,1], index: 4, kind: input, shape index: {}]   ;;  %s689_s5 = inlined_call_operand.vmem [shape: f32[32,32], index: 5, kind: input, shape index: {}]   ;;  %s690_s6 = inlined_call_operand.vmem [shape: f32[32,1], index: 6, kind: input, shape index: {}]   ;;  %s691_s7 = inlined_call_operand.vmem [shape: f32[4,32], index: 7, kind: input, shape index: {}]   ;;  %s692_s8 = inlined_call_operand.vmem [shape: f32[4,1], index: 8, kind: input, shape index: {}]   ;;  %s693_s9 = inlined_call_operand.hbm [shape: f32[4,128], index: 9, kind: output, shape index: {}]  }
   0x1   :  { %v33_v0 = vld [vmem:[%s684_s0] sm:$0xf]  ;;  %v36_v2 = vld [vmem:[%s687_s3 + $0x8] sm:$0xff]  ;;  %v37_v3 = vld [vmem:[%s687_s3 + $0x10] sm:$0xff]  ;;  %499 = vset.pattern.permute.xlu0 %v539_v5  ;;  %500 = vset.pattern.permute.xlu1 %v539_v5 }
   0x2   :  { %v35_v1 = vld [vmem:[%s687_s3] sm:$0xff]  ;;  %462 = vmatprep.subr.msk.mxu0 %vm86_vm0, %v33_v0  ;;  %v42_v4 = vld [vmem:[%s686_s2 + $0x18] sm:$0xff]  ;;  %v40_v6 = vld [vmem:[%s686_s2 + $0x8] sm:$0xff] }
   0x3   :  { %464 = vmatprep.mubr.msk.f32.mxu0 %vm73_vm1, %v35_v1  ;;  %463 = vmatpush3.msk.msra.mxu0 %vm86_vm0, %v33_v0  ;;  %v38_v7 = vld [vmem:[%s687_s3 + $0x18] sm:$0xff]  ;;  %v41_v8 = vld [vmem:[%s686_s2 + $0x10] sm:$0xff] }
   0x4   :  { %465 = vmatmul.mubr.msk.f32.vlgmr.msra.gmra.mxu0 %vm73_vm1, %v36_v2  ;;  %60 = vperm.xlu0 %499, %v42_v4   ;;  %v178_v9 = vld [vmem:[%s688_s4 + $0x18] sm:$0xff] }
   0x5   :  { %467 = vmatprep.mubr.msk.f32.mxu0 %vm73_vm1, %v37_v3  ;;  %50 = vperm.xlu1 %500, %v40_v6  }
   0x6   :  { %14 = vsyncpa [#allocation3], 0  ;;  %v39_v10 = vld [vmem:[%s686_s2] sm:$0xff]  ;;  %v177_v11 = vld [vmem:[%s688_s4 + $0x10] sm:$0xff]  ;;  %vm235_vm2 = vcmask 261120   ;;  %v540_v52 = vmov 0.0  }
   0x7   :  { %v176_v12 = vld [vmem:[%s688_s4 + $0x8] sm:$0xff]  ;;  %v175_v13 = vld [vmem:[%s688_s4] sm:$0xff]  ;;  %v214_v14 = vld [vmem:[%s690_s6 + $0x18] sm:$0xff]  ;;  %484 = vmatprep.subr.mxu0 %v540_v52  ;;  %vm541_vm3 = vmmov 0   ;;  %s542_s27 = smov [#allocation2]  }
   0x8   :  { %468 = vmatmul.mubr.msk.f32.gmra.mxu0 %vm73_vm1, %v38_v7  ;;  %55 = vperm.xlu0 %499, %v41_v8   ;;  %v213_v15 = vld [vmem:[%s690_s6 + $0x10] sm:$0xff]  ;;  %v212_v16 = vld [vmem:[%s690_s6 + $0x8] sm:$0xff]  ;;  %v211_v17 = vld [vmem:[%s690_s6] sm:$0xff]  ;;  %s425_s3 = sshll.u32 %s542_s27, 4  ;;  %s426_s3 = int_to_ptr.vmem [resolvable:$true] %s425_s3 }
   0x9   :  { %196 = vperm.xlu1 %500, %v178_v9   ;;  %v338_v18 = vld [vmem:[%s692_s8] sm:$0xf]  ;;  %v208_v49 = vld [vmem:[%s689_s5 + $0x8] sm:$0xff]  ;;  %v209_v50 = vld [vmem:[%s689_s5 + $0x10] sm:$0xff]  ;;  %492 = vmatprep.mubr.msk.f32.mxu0 %vm541_vm3, %v540_v52  ;;  %s517_s28 = scalar_lea.vmem %s426_s3, 64  ;;  %p522_p1 = scmp.lt.s32.totalorder %s426_s3, %s426_s3 }
   0xa   :  { %v207_v19 = vld [vmem:[%s689_s5] sm:$0xff]  ;;  %v210_v51 = vld [vmem:[%s689_s5 + $0x18] sm:$0xff]  ;;  %p518_p0 = scmp.ne.s32.totalorder %s426_s3, %s517_s28  ;;  %p523_p2 = scmp.lt.s32.totalorder %s517_s28, %s517_s28 }
   0xb   :  { %478 = vmatprep.mubr.msk.f32.mxu1 %vm235_vm2, %v207_v19  ;;  %v658_v23 = vld [vmem:[%s685_s1] ss:$0 sm:$0xff] }
   0xc   :  { %45 = vperm.xlu0 %499, %v39_v10   ;;  %v337_v4 = vld [vmem:[%s691_s7] sm:$0xf]  ;;  %p524_p3 = por %p523_p2, %p522_p1 }
   0xd   :  { %191 = vperm.xlu1 %500, %v177_v11  }
   0xe   :  { %p525_p4 = pnand %p524_p3, %p518_p0 }
  0x10   :  { %186 = vperm.xlu0 %499, %v176_v12  }
  0x11   :  { %181 = vperm.xlu1 %500, %v175_v13  }
  0x14   :  { %232 = vperm.xlu0 %499, %v214_v14  }
  0x15   :  { %227 = vperm.xlu1 %500, %v213_v15  }
  0x18   :  { %222 = vperm.xlu0 %499, %v212_v16  }
  0x19   :  { %217 = vperm.xlu1 %500, %v211_v17  }
  0x1c   :  { %341 = vperm.xlu0 %499, %v338_v18  }
  0x7f   :  { %v61_v20 = vpop.permute.xlu0 %60 }
  0x80   :  { %v51_v21 = vpop.permute.xlu1 %50  ;;  %v72_v29 = vmul.f32 %v658_v23, %v61_v20 }
  0x81   :  { %v70_v26 = vmul.f32 %v658_v23, %v51_v21 }
  0x83   :  { %v56_v22 = vpop.permute.xlu0 %55 }
  0x84   :  { %v197_v24 = vpop.permute.xlu1 %196  ;;  %v71_v32 = vmul.f32 %v658_v23, %v56_v22 }
  0x87   :  { %v46_v27 = vpop.permute.xlu0 %45 }
  0x88   :  { %v192_v30 = vpop.permute.xlu1 %191  ;;  %v69_v33 = vmul.f32 %v658_v23, %v46_v27 }
  0x8b   :  { %v187_v40 = vpop.permute.xlu0 %186 }
  0x8c   :  { %v182_v43 = vpop.permute.xlu1 %181 }
  0x8f   :  { %v233_v53 = vpop.permute.xlu0 %232 }
  0x90   :  { %v228_v55 = vpop.permute.xlu1 %227 }
  0x93   :  { %v223_v59 = vpop.permute.xlu0 %222 }
  0x94   :  { %v218_v63 = vpop.permute.xlu1 %217 }
  0x97   :  { %v342_v6 = vpop.permute.xlu0 %341 }
  0xc4   :  { %v466_v25 = vpop.f32.mrf.mxu0 }
  0xc5   :  { %v162_v34 = vadd.f32 %v466_v25, %v70_v26 }
  0xc6   :  { %v156_v28 = vpop.f32.mrf.mxu0 }
  0xc7   :  { %v157_v37 = vadd.f32 %v156_v28, %v69_v33  ;;  %v200_v41 = vadd.f32 %v187_v40, %v162_v34 }
  0xc8   :  { %v469_v31 = vpop.f32.mrf.mxu0 }
  0xc9   :  { %v172_v35 = vadd.f32 %v469_v31, %v72_v29  ;;  %v199_v44 = vadd.f32 %v182_v43, %v157_v37 }
  0xca   :  { %v166_v36 = vpop.f32.mrf.mxu0 }
  0xcb   :  { %v202_v38 = vadd.f32 %v197_v24, %v172_v35  ;;  %v167_v39 = vadd.f32 %v166_v36, %v71_v32 }
  0xcd   :  { %501 = vtanh.f32 %v202_v38  ;;  %v201_v42 = vadd.f32 %v192_v30, %v167_v39 }
  0xcf   :  { %503 = vtanh.f32 %v201_v42 }
  0xd0   :  { %505 = vtanh.f32 %v200_v41 }
  0xd1   :  { %507 = vtanh.f32 %v199_v44 }
  0xda   :  { %v502_v45 = vpop.eup %501 }
  0xdb   :  { %470 = vmatprep.subr.mxu1 %v502_v45 }
  0xdc   :  { %v504_v46 = vpop.eup %503  ;;  %471 = vmatpush3.msra.mxu1 %v502_v45 }
  0xdd   :  { %472 = vmatprep.subr.mxu1 %v504_v46  ;;  %v506_v47 = vpop.eup %505 }
  0xde   :  { %473 = vmatpush3.msra.mxu1 %v504_v46  ;;  %v508_v48 = vpop.eup %507 }
  0xdf   :  { %474 = vmatprep.subr.mxu1 %v506_v47 }
  0xe0   :  { %475 = vmatpush3.msra.mxu1 %v506_v47 }
  0xe1   :  { %476 = vmatprep.subr.mxu1 %v508_v48 }
  0xe2   :  { %477 = vmatpush3.msra.mxu1 %v508_v48 }
  0xe3   :  { %479 = vmatmul.mubr.msk.f32.vlgmr.msra.gmra.mxu1 %vm235_vm2, %v208_v49 }
  0xe4   :  { %481 = vmatprep.mubr.msk.f32.mxu1 %vm235_vm2, %v209_v50 }
  0xe7   :  { %482 = vmatmul.mubr.msk.f32.gmra.mxu1 %vm235_vm2, %v210_v51 }
 0x1a3   :  { %v480_v54 = vpop.f32.mrf.mxu1 }
 0x1a4   :  { %v320_v61 = vadd.f32 %v480_v54, %v223_v59 }
 0x1a5   :  { %v314_v56 = vpop.f32.mrf.mxu1 }
 0x1a6   :  { %v315_v0 = vadd.f32 %v314_v56, %v218_v63 }
 0x1a7   :  { %v483_v57 = vpop.f32.mrf.mxu1 }
 0x1a8   :  { %v330_v58 = vadd.f32 %v483_v57, %v233_v53 }
 0x1a9   :  { %v324_v60 = vpop.f32.mrf.mxu1 }
 0x1aa   :  { %509 = vtanh.f32 %v330_v58  ;;  %v325_v62 = vadd.f32 %v324_v60, %v228_v55 }
 0x1ac   :  { %511 = vtanh.f32 %v325_v62 }
 0x1ad   :  { %513 = vtanh.f32 %v320_v61 }
 0x1ae   :  { %515 = vtanh.f32 %v315_v0 }
 0x1b7   :  { %v510_v1 = vpop.eup %509 }
 0x1b8   :  { %485 = vmatpush3.msra.mxu0 %v510_v1 }
 0x1b9   :  { %v512_v2 = vpop.eup %511  ;;  %486 = vmatprep.subr.mxu0 %v540_v52 }
 0x1ba   :  { %487 = vmatpush3.msra.mxu0 %v512_v2  ;;  %v514_v3 = vpop.eup %513 }
 0x1bb   :  { %488 = vmatprep.subr.mxu0 %v540_v52  ;;  %v516_v5 = vpop.eup %515 }
 0x1bc   :  { %489 = vmatpush3.msra.mxu0 %v514_v3 }
 0x1bd   :  { %490 = vmatprep.subr.mxu0 %v540_v52 }
 0x1be   :  { %491 = vmatpush3.msra.mxu0 %v516_v5 }
 0x1bf   :  { %493 = vmatmul.mubr.msk.f32.vlgmr.msra.gmra.mxu0 %vm235_vm2, %v337_v4 }
 0x27f   :  { %v413_v7 = vpop.f32.mrf.mxu0 }
 0x280   :  { %v414_v8 = vadd.f32 %v413_v7, %v342_v6 }
 0x281   :  { %v494_v9 = vpop.f32.mrf.mxu0 }
 0x282   :  { %v417_v10 = vmul.f32 %v658_v23, %v414_v8 }
 0x284   :  { %418 = vst [vmem:[#allocation2] sm:$0xf] %v417_v10 }
 0x285   :  { %528 = shalt.err (!%p525_p4)
}
 0x286   :  { %428 = dma.vmem_to_hbm [thread:$0]  %s426_s3, 64, %s693_s9, [#allocation3]  }
 0x287   :  { %537 = dma.done.wait [#allocation3], 64  }
 0x288   :  { %538 = vsyncadd [#allocation3], 4294967232 }
 0x289   :  { %432 = vsyncpa [#allocation3], 1 }

</bundles_post_ra>
